<compile_context>
chip_gen: v5e
topology: v5e:2x2
jax: 0.10.0
libtpu: 0.0.40
codegen_flags: <defaults>
</compile_context>

<pallas_src>
import jax
import jax.numpy as jnp
from jax.experimental import pallas as pl
from jax.experimental.pallas import tpu as pltpu


def _small_matmul_vpu(w, v):
    """(Co, Ci) @ (Ci, T) via Ci broadcast-FMAs on the VPU (tiny-Ci path)."""
    _, ci = w.shape
    acc = w[:, 0:1] * v[0:1, :]
    for c in range(1, ci):
        acc = acc + w[:, c:c + 1] * v[c:c + 1, :]
    return acc


def _ffm_kernel(g_ref, x_ref, wg_ref, wx_ref, b_ref, wpsi_ref, scal_ref, out_ref):
    # Blocks: g (1, F_g, T), x (1, F_l, T), wg (F_int, F_g), wx (F_int, F_l),
    # b/wpsi (F_int, 1), scal (2,) in SMEM = [prelu_alpha, bpsi'].
    g = g_ref[0].astype(jnp.float32)             # (F_g, T)  lane-dense
    x = x_ref[0].astype(jnp.float32)             # (F_l, T)
    wg = wg_ref[...]                             # (F_int, F_g)
    wx = wx_ref[...]                             # (F_int, F_l)

    # Tiny 1x1 convs: a handful of VPU FMAs when the contraction dim is small;
    # fall back to the MXU for real channel counts where a matmul pays off.
    if wg.shape[1] <= 32:
        g1 = _small_matmul_vpu(wg, g)
    else:
        g1 = jnp.dot(wg, g, preferred_element_type=jnp.float32)
    if wx.shape[1] <= 32:
        x1 = _small_matmul_vpu(wx, x)
    else:
        x1 = jnp.dot(wx, x, preferred_element_type=jnp.float32)

    h = g1 + x1 + b_ref[...]                     # fused bias bg'+bx', (F_int, T)

    alpha = scal_ref[0]                          # PReLU (PyTorch default: 1 shared alpha)
    h = jnp.where(h >= 0.0, h, alpha * h)

    # psi: sublane (XLU) reduce + scalar bias instead of an output-width-1 MXU matmul.
    p = jnp.sum(wpsi_ref[...] * h, axis=0, keepdims=True) + scal_ref[1]   # (1, T)
    p = jax.nn.sigmoid(p)                        # EUP exp path, (1, T) row -> negligible

    out_ref[0] = (x * p).astype(out_ref.dtype)   # psi broadcast over channel sublanes


def _fold_bn(w, b, gamma, beta, mean, var, eps=1e-5):
    """Fold eval-mode BatchNorm into a preceding linear layer.

    w: (Cin, Cout), b: (Cout,).  Returns (w', b') with BN(x @ w + b) == x @ w' + b'.
    """
    s = gamma / jnp.sqrt(var + eps)
    return w * s[None, :], b * s + (beta - mean * s)


def ffm_forward(g, x, params, *, tile_hw=2048, eps=1e-5):
    """g, x: NCHW float32 arrays. Returns NCHW output (same shape as x)."""
    N, F_g, H, W = g.shape
    _, F_l, _, _ = x.shape
    F_int = params["wg"].shape[1]
    HW = H * W

    wg, bg = _fold_bn(params["wg"], params["bg"], params["bn_g_gamma"],
                      params["bn_g_beta"], params["bn_g_mean"], params["bn_g_var"], eps)
    wx, bx = _fold_bn(params["wx"], params["bx"], params["bn_x_gamma"],
                      params["bn_x_beta"], params["bn_x_mean"], params["bn_x_var"], eps)
    wpsi, bpsi = _fold_bn(params["wpsi"], params["bpsi"], params["bn_p_gamma"],
                          params["bn_p_beta"], params["bn_p_mean"], params["bn_p_var"], eps)

    # Pre-transpose weights for the channels-on-sublane layout; fuse the two biases.
    wg_t = jnp.asarray(wg.T, jnp.float32)                # (F_int, F_g)
    wx_t = jnp.asarray(wx.T, jnp.float32)                # (F_int, F_l)
    b_col = (bg + bx).reshape(F_int, 1).astype(jnp.float32)
    wpsi_col = wpsi.reshape(F_int, 1).astype(jnp.float32)
    # Scalars live in SMEM: [prelu_alpha, bpsi'].
    scal = jnp.concatenate([params["prelu_alpha"].reshape(1),
                            bpsi.reshape(1)]).astype(jnp.float32)

    # NCHW -> (N, C, H*W): a free reshape, no transpose, no extra HBM pass.
    g3 = g.reshape(N, F_g, HW)
    x3 = x.reshape(N, F_l, HW)

    # Pixel tile: multiple of 128 lanes, as large as useful (mem-bound kernel),
    # capped by the (rounded-up) pixel count.
    hw_ceil = ((HW + 127) // 128) * 128
    tile = max(128, (min(tile_hw, hw_ceil) // 128) * 128)
    hw_pad = pl.cdiv(HW, tile) * tile
    if hw_pad != HW:
        # Zero-padded tail pixels produce out = 0 * psi = 0 and are sliced off.
        g3 = jnp.pad(g3, ((0, 0), (0, 0), (0, hw_pad - HW)))
        x3 = jnp.pad(x3, ((0, 0), (0, 0), (0, hw_pad - HW)))

    grid = (N, hw_pad // tile)

    out_flat = pl.pallas_call(
        _ffm_kernel,
        out_shape=jax.ShapeDtypeStruct((N, F_l, hw_pad), x.dtype),
        grid_spec=pltpu.PrefetchScalarGridSpec(
            num_scalar_prefetch=0,
            grid=grid,
            in_specs=[
                pl.BlockSpec((1, F_g, tile), lambda n, t: (n, 0, t)),   # g tile
                pl.BlockSpec((1, F_l, tile), lambda n, t: (n, 0, t)),   # x tile
                pl.BlockSpec((F_int, F_g), lambda n, t: (0, 0)),        # Wg'^T (resident)
                pl.BlockSpec((F_int, F_l), lambda n, t: (0, 0)),        # Wx'^T (resident)
                pl.BlockSpec((F_int, 1), lambda n, t: (0, 0)),          # bg'+bx'
                pl.BlockSpec((F_int, 1), lambda n, t: (0, 0)),          # wpsi'
                pl.BlockSpec(memory_space=pltpu.MemorySpace.SMEM),      # [alpha, bpsi']
            ],
            out_specs=pl.BlockSpec((1, F_l, tile), lambda n, t: (n, 0, t)),
        ),
        compiler_params=pltpu.CompilerParams(
            # Both grid axes independent -> shardable across v7x's 2 TensorCores.
            dimension_semantics=("parallel", "parallel"),
            # Tiny per-tile footprint; stays well under v7x's 64 MiB VMEM even
            # with double-buffered 2048-pixel tiles.
            vmem_limit_bytes=32 * 1024 * 1024,
        ),
    )(g3, x3, wg_t, wx_t, b_col, wpsi_col, scal)

    return out_flat[:, :, :HW].reshape(N, F_l, H, W)


def init_params(key, F_g, F_l, F_int):
    ks = jax.random.split(key, 8)
    return {
        # Conv2d 1x1 weights stored as (Cin, Cout) matmul weights.
        "wg": 0.1 * jax.random.normal(ks[0], (F_g, F_int), jnp.float32),
        "bg": 0.1 * jax.random.normal(ks[1], (F_int,), jnp.float32),
        "wx": 0.1 * jax.random.normal(ks[2], (F_l, F_int), jnp.float32),
        "bx": 0.1 * jax.random.normal(ks[3], (F_int,), jnp.float32),
        "wpsi": 0.1 * jax.random.normal(ks[4], (F_int, 1), jnp.float32),
        "bpsi": 0.1 * jax.random.normal(ks[5], (1,), jnp.float32),
        # BatchNorm (eval-mode) params; non-trivial deterministic values.
        "bn_g_gamma": 1.0 + 0.05 * jax.random.normal(ks[6], (F_int,), jnp.float32),
        "bn_g_beta": jnp.full((F_int,), 0.01, jnp.float32),
        "bn_g_mean": jnp.full((F_int,), 0.02, jnp.float32),
        "bn_g_var": jnp.full((F_int,), 1.1, jnp.float32),
        "bn_x_gamma": 1.0 + 0.05 * jax.random.normal(ks[7], (F_int,), jnp.float32),
        "bn_x_beta": jnp.full((F_int,), -0.01, jnp.float32),
        "bn_x_mean": jnp.full((F_int,), -0.02, jnp.float32),
        "bn_x_var": jnp.full((F_int,), 0.9, jnp.float32),
        "bn_p_gamma": jnp.full((1,), 1.05, jnp.float32),
        "bn_p_beta": jnp.full((1,), 0.03, jnp.float32),
        "bn_p_mean": jnp.full((1,), 0.0, jnp.float32),
        "bn_p_var": jnp.full((1,), 1.0, jnp.float32),
        # PReLU default init in PyTorch: 0.25.
        # TODO(synk): PyTorch nn.PReLU() uses a single shared alpha; per-channel
        # PReLU would need a (F_int, 1) alpha column instead of a scalar.
        "prelu_alpha": jnp.array([0.25], jnp.float32),
    }


def ffm_reference(g, x, params, eps=1e-5):
    """Pure-JAX reference for correctness check (same folded-BN semantics)."""
    wg, bg = _fold_bn(params["wg"], params["bg"], params["bn_g_gamma"],
                      params["bn_g_beta"], params["bn_g_mean"], params["bn_g_var"], eps)
    wx, bx = _fold_bn(params["wx"], params["bx"], params["bn_x_gamma"],
                      params["bn_x_beta"], params["bn_x_mean"], params["bn_x_var"], eps)
    wpsi, bpsi = _fold_bn(params["wpsi"], params["bpsi"], params["bn_p_gamma"],
                          params["bn_p_beta"], params["bn_p_mean"], params["bn_p_var"], eps)
    gh = jnp.transpose(g, (0, 2, 3, 1))
    xh = jnp.transpose(x, (0, 2, 3, 1))
    g1 = gh @ wg + bg
    x1 = xh @ wx + bx
    h = g1 + x1
    a = params["prelu_alpha"][0]
    h = jnp.where(h >= 0, h, a * h)
    p = jax.nn.sigmoid(h @ wpsi + bpsi)
    out = xh * p
    return jnp.transpose(out, (0, 3, 1, 2))


if __name__ == "__main__":
    # Small shapes consistent with FFM(F_g=4, F_l=4, F_int=8), NCHW inputs.
    N, F_g, F_l, F_int, H, W = 2, 4, 4, 8, 16, 16
    key = jax.random.PRNGKey(0)
    kg, kx, kp = jax.random.split(key, 3)
    g = jax.random.normal(kg, (N, F_g, H, W), jnp.float32)
    x = jax.random.normal(kx, (N, F_l, H, W), jnp.float32)
    params = init_params(kp, F_g, F_l, F_int)

    out = ffm_forward(g, x, params)
    out = jax.block_until_ready(out)

    ref = ffm_reference(g, x, params)
    assert out.shape == x.shape
    assert jnp.allclose(out, ref, atol=1e-5, rtol=1e-5)
    print("KERNEL_OK")
</pallas_src>

<mosaic_0001>
module attributes {stable_mosaic.version = 11 : i64} {
  func.func @_ffm_kernel(%arg0: i32, %arg1: i32, %arg2: memref<1x4x256xf32, #tpu.memory_space<vmem>>, %arg3: memref<1x4x256xf32, #tpu.memory_space<vmem>>, %arg4: memref<8x4xf32, #tpu.memory_space<vmem>>, %arg5: memref<8x4xf32, #tpu.memory_space<vmem>>, %arg6: memref<8x1xf32, #tpu.memory_space<vmem>>, %arg7: memref<8x1xf32, #tpu.memory_space<vmem>>, %arg8: memref<2xf32, #tpu.memory_space<smem>>, %arg9: memref<1x4x256xf32, #tpu.memory_space<vmem>>) attributes {dimension_semantics = [#tpu.dimension_semantics<parallel>, #tpu.dimension_semantics<parallel>], iteration_bounds = array<i64: 2, 1>, scalar_prefetch = 0 : i64, scratch_operands = 0 : i64, tpu.core_type = #tpu.core_type<tc>, window_params = [{transform_indices = @transform_0, window_bounds = array<i64: 1, 4, 256>}, {transform_indices = @transform_1, window_bounds = array<i64: 1, 4, 256>}, {pipeline_mode = #tpu.pipeline_mode<synchronous>, transform_indices = @transform_2, window_bounds = array<i64: 8, 4>}, {pipeline_mode = #tpu.pipeline_mode<synchronous>, transform_indices = @transform_3, window_bounds = array<i64: 8, 4>}, {pipeline_mode = #tpu.pipeline_mode<synchronous>, transform_indices = @transform_4, window_bounds = array<i64: 8, 1>}, {pipeline_mode = #tpu.pipeline_mode<synchronous>, transform_indices = @transform_5, window_bounds = array<i64: 8, 1>}, {transform_indices = @transform_6, window_bounds = array<i64: 2>}, {transform_indices = @transform_7, window_bounds = array<i64: 1, 4, 256>}]} {
    %c0 = arith.constant 0 : index
    %c0_0 = arith.constant 0 : index
    %c0_1 = arith.constant 0 : index
    %0 = vector.load %arg2[%c0, %c0_0, %c0_1] : memref<1x4x256xf32, #tpu.memory_space<vmem>>, vector<1x4x256xf32>
    %1 = vector.shape_cast %0 : vector<1x4x256xf32> to vector<4x256xf32>
    %c0_2 = arith.constant 0 : index
    %c0_3 = arith.constant 0 : index
    %c0_4 = arith.constant 0 : index
    %2 = vector.load %arg3[%c0_2, %c0_3, %c0_4] : memref<1x4x256xf32, #tpu.memory_space<vmem>>, vector<1x4x256xf32>
    %3 = vector.shape_cast %2 : vector<1x4x256xf32> to vector<4x256xf32>
    %c0_5 = arith.constant 0 : index
    %c0_6 = arith.constant 0 : index
    %4 = vector.load %arg4[%c0_5, %c0_6] : memref<8x4xf32, #tpu.memory_space<vmem>>, vector<8x4xf32>
    %c0_7 = arith.constant 0 : index
    %c0_8 = arith.constant 0 : index
    %5 = vector.load %arg5[%c0_7, %c0_8] : memref<8x4xf32, #tpu.memory_space<vmem>>, vector<8x4xf32>
    %6 = vector.extract_strided_slice %4 {offsets = [0, 0], sizes = [8, 1], strides = [1, 1]} : vector<8x4xf32> to vector<8x1xf32>
    %7 = vector.extract_strided_slice %1 {offsets = [0, 0], sizes = [1, 256], strides = [1, 1]} : vector<4x256xf32> to vector<1x256xf32>
    %8 = vector.broadcast %6 : vector<8x1xf32> to vector<8x256xf32>
    %9 = vector.broadcast %7 : vector<1x256xf32> to vector<8x256xf32>
    %10 = arith.mulf %8, %9 : vector<8x256xf32>
    %11 = vector.extract_strided_slice %4 {offsets = [0, 1], sizes = [8, 1], strides = [1, 1]} : vector<8x4xf32> to vector<8x1xf32>
    %12 = vector.extract_strided_slice %1 {offsets = [1, 0], sizes = [1, 256], strides = [1, 1]} : vector<4x256xf32> to vector<1x256xf32>
    %13 = vector.broadcast %11 : vector<8x1xf32> to vector<8x256xf32>
    %14 = vector.broadcast %12 : vector<1x256xf32> to vector<8x256xf32>
    %15 = arith.mulf %13, %14 : vector<8x256xf32>
    %16 = arith.addf %10, %15 : vector<8x256xf32>
    %17 = vector.extract_strided_slice %4 {offsets = [0, 2], sizes = [8, 1], strides = [1, 1]} : vector<8x4xf32> to vector<8x1xf32>
    %18 = vector.extract_strided_slice %1 {offsets = [2, 0], sizes = [1, 256], strides = [1, 1]} : vector<4x256xf32> to vector<1x256xf32>
    %19 = vector.broadcast %17 : vector<8x1xf32> to vector<8x256xf32>
    %20 = vector.broadcast %18 : vector<1x256xf32> to vector<8x256xf32>
    %21 = arith.mulf %19, %20 : vector<8x256xf32>
    %22 = arith.addf %16, %21 : vector<8x256xf32>
    %23 = vector.extract_strided_slice %4 {offsets = [0, 3], sizes = [8, 1], strides = [1, 1]} : vector<8x4xf32> to vector<8x1xf32>
    %24 = vector.extract_strided_slice %1 {offsets = [3, 0], sizes = [1, 256], strides = [1, 1]} : vector<4x256xf32> to vector<1x256xf32>
    %25 = vector.broadcast %23 : vector<8x1xf32> to vector<8x256xf32>
    %26 = vector.broadcast %24 : vector<1x256xf32> to vector<8x256xf32>
    %27 = arith.mulf %25, %26 : vector<8x256xf32>
    %28 = arith.addf %22, %27 : vector<8x256xf32>
    %29 = vector.extract_strided_slice %5 {offsets = [0, 0], sizes = [8, 1], strides = [1, 1]} : vector<8x4xf32> to vector<8x1xf32>
    %30 = vector.extract_strided_slice %3 {offsets = [0, 0], sizes = [1, 256], strides = [1, 1]} : vector<4x256xf32> to vector<1x256xf32>
    %31 = vector.broadcast %29 : vector<8x1xf32> to vector<8x256xf32>
    %32 = vector.broadcast %30 : vector<1x256xf32> to vector<8x256xf32>
    %33 = arith.mulf %31, %32 : vector<8x256xf32>
    %34 = vector.extract_strided_slice %5 {offsets = [0, 1], sizes = [8, 1], strides = [1, 1]} : vector<8x4xf32> to vector<8x1xf32>
    %35 = vector.extract_strided_slice %3 {offsets = [1, 0], sizes = [1, 256], strides = [1, 1]} : vector<4x256xf32> to vector<1x256xf32>
    %36 = vector.broadcast %34 : vector<8x1xf32> to vector<8x256xf32>
    %37 = vector.broadcast %35 : vector<1x256xf32> to vector<8x256xf32>
    %38 = arith.mulf %36, %37 : vector<8x256xf32>
    %39 = arith.addf %33, %38 : vector<8x256xf32>
    %40 = vector.extract_strided_slice %5 {offsets = [0, 2], sizes = [8, 1], strides = [1, 1]} : vector<8x4xf32> to vector<8x1xf32>
    %41 = vector.extract_strided_slice %3 {offsets = [2, 0], sizes = [1, 256], strides = [1, 1]} : vector<4x256xf32> to vector<1x256xf32>
    %42 = vector.broadcast %40 : vector<8x1xf32> to vector<8x256xf32>
    %43 = vector.broadcast %41 : vector<1x256xf32> to vector<8x256xf32>
    %44 = arith.mulf %42, %43 : vector<8x256xf32>
    %45 = arith.addf %39, %44 : vector<8x256xf32>
    %46 = vector.extract_strided_slice %5 {offsets = [0, 3], sizes = [8, 1], strides = [1, 1]} : vector<8x4xf32> to vector<8x1xf32>
    %47 = vector.extract_strided_slice %3 {offsets = [3, 0], sizes = [1, 256], strides = [1, 1]} : vector<4x256xf32> to vector<1x256xf32>
    %48 = vector.broadcast %46 : vector<8x1xf32> to vector<8x256xf32>
    %49 = vector.broadcast %47 : vector<1x256xf32> to vector<8x256xf32>
    %50 = arith.mulf %48, %49 : vector<8x256xf32>
    %51 = arith.addf %45, %50 : vector<8x256xf32>
    %52 = arith.addf %28, %51 : vector<8x256xf32>
    %c0_9 = arith.constant 0 : index
    %c0_10 = arith.constant 0 : index
    %53 = vector.load %arg6[%c0_9, %c0_10] : memref<8x1xf32, #tpu.memory_space<vmem>>, vector<8x1xf32>
    %54 = vector.broadcast %53 : vector<8x1xf32> to vector<8x256xf32>
    %55 = arith.addf %52, %54 : vector<8x256xf32>
    %c0_11 = arith.constant 0 : index
    %56 = memref.load %arg8[%c0_11] : memref<2xf32, #tpu.memory_space<smem>>
    %cst = arith.constant 0.000000e+00 : f32
    %57 = vector.broadcast %cst : f32 to vector<8x256xf32>
    %58 = arith.cmpf oge, %55, %57 : vector<8x256xf32>
    %59 = vector.broadcast %56 : f32 to vector<8x256xf32>
    %60 = arith.mulf %59, %55 : vector<8x256xf32>
    %61 = arith.select %58, %55, %60 : vector<8x256xi1>, vector<8x256xf32>
    %c0_12 = arith.constant 0 : index
    %c0_13 = arith.constant 0 : index
    %62 = vector.load %arg7[%c0_12, %c0_13] : memref<8x1xf32, #tpu.memory_space<vmem>>, vector<8x1xf32>
    %63 = vector.broadcast %62 : vector<8x1xf32> to vector<8x256xf32>
    %64 = arith.mulf %63, %61 : vector<8x256xf32>
    %cst_14 = arith.constant dense<0.000000e+00> : vector<256xf32>
    %65 = vector.multi_reduction <add>, %64, %cst_14 [0] : vector<8x256xf32> to vector<256xf32>
    %66 = vector.shape_cast %65 : vector<256xf32> to vector<1x256xf32>
    %c1 = arith.constant 1 : index
    %67 = memref.load %arg8[%c1] : memref<2xf32, #tpu.memory_space<smem>>
    %68 = vector.broadcast %67 : f32 to vector<1x256xf32>
    %69 = arith.addf %66, %68 : vector<1x256xf32>
    %70 = arith.negf %69 : vector<1x256xf32>
    %71 = math.exp %70 : vector<1x256xf32>
    %cst_15 = arith.constant 1.000000e+00 : f32
    %72 = vector.broadcast %cst_15 : f32 to vector<1x256xf32>
    %73 = arith.addf %72, %71 : vector<1x256xf32>
    %74 = arith.divf %72, %73 : vector<1x256xf32>
    %75 = vector.broadcast %74 : vector<1x256xf32> to vector<4x256xf32>
    %76 = arith.mulf %3, %75 : vector<4x256xf32>
    %c0_16 = arith.constant 0 : index
    %c0_17 = arith.constant 0 : index
    %c0_18 = arith.constant 0 : index
    %77 = vector.load %arg9[%c0_16, %c0_17, %c0_18] : memref<1x4x256xf32, #tpu.memory_space<vmem>>, vector<1x4x256xf32>
    %78 = vector.shape_cast %77 : vector<1x4x256xf32> to vector<4x256xf32>
    %79 = vector.shape_cast %76 : vector<4x256xf32> to vector<1x4x256xf32>
    tpu.vector_store %arg9[%c0_16, %c0_17, %c0_18], %79 {strides = array<i32>} : memref<1x4x256xf32, #tpu.memory_space<vmem>>, vector<1x4x256xf32>,
    return
  }
  func.func @transform_0(%arg0: i32, %arg1: i32) -> (i32, i32, i32) {
    %c0_i32 = arith.constant 0 : i32
    %c0_i32_0 = arith.constant 0 : i32
    return %arg0, %c0_i32, %arg1 : i32, i32, i32
  }
  func.func @transform_1(%arg0: i32, %arg1: i32) -> (i32, i32, i32) {
    %c0_i32 = arith.constant 0 : i32
    %c0_i32_0 = arith.constant 0 : i32
    return %arg0, %c0_i32, %arg1 : i32, i32, i32
  }
  func.func @transform_2(%arg0: i32, %arg1: i32) -> (i32, i32) {
    %c0_i32 = arith.constant 0 : i32
    %c0_i32_0 = arith.constant 0 : i32
    %c0_i32_1 = arith.constant 0 : i32
    return %c0_i32, %c0_i32_0 : i32, i32
  }
  func.func @transform_3(%arg0: i32, %arg1: i32) -> (i32, i32) {
    %c0_i32 = arith.constant 0 : i32
    %c0_i32_0 = arith.constant 0 : i32
    %c0_i32_1 = arith.constant 0 : i32
    return %c0_i32, %c0_i32_0 : i32, i32
  }
  func.func @transform_4(%arg0: i32, %arg1: i32) -> (i32, i32) {
    %c0_i32 = arith.constant 0 : i32
    %c0_i32_0 = arith.constant 0 : i32
    %c0_i32_1 = arith.constant 0 : i32
    return %c0_i32, %c0_i32_0 : i32, i32
  }
  func.func @transform_5(%arg0: i32, %arg1: i32) -> (i32, i32) {
    %c0_i32 = arith.constant 0 : i32
    %c0_i32_0 = arith.constant 0 : i32
    %c0_i32_1 = arith.constant 0 : i32
    return %c0_i32, %c0_i32_0 : i32, i32
  }
  func.func @transform_6(%arg0: i32, %arg1: i32) -> i32 {
    %c0_i32 = arith.constant 0 : i32
    %c0_i32_0 = arith.constant 0 : i32
    return %c0_i32 : i32
  }
  func.func @transform_7(%arg0: i32, %arg1: i32) -> (i32, i32, i32) {
    %c0_i32 = arith.constant 0 : i32
    %c0_i32_0 = arith.constant 0 : i32
    return %arg0, %c0_i32, %arg1 : i32, i32, i32
  }
}

</mosaic_0001>

<bundles_post_ra>
// kernel: tpu_custom_call.1
= control target key start
LH: loop header
LB: loop body
LE: loop exit
PB: predicated region body
PF: predicated region fallthrough
CT: control target
= control target key end

     0   :  { %s1187_s0 = inlined_call_operand.vmem [shape: f32[2,4,256], index: 0, kind: input, shape index: {}]   ;;  %s1188_s1 = inlined_call_operand.hbm [shape: f32[2,4,256], index: 1, kind: input, shape index: {}]   ;;  %s1189_s2 = inlined_call_operand.vmem [shape: f32[8,4], index: 2, kind: input, shape index: {}]   ;;  %s1190_s3 = inlined_call_operand.vmem [shape: f32[8,4], index: 3, kind: input, shape index: {}]   ;;  %s1191_s4 = inlined_call_operand.vmem [shape: f32[8,1], index: 4, kind: input, shape index: {}]   ;;  %s1192_s5 = inlined_call_operand.vmem [shape: f32[8,1], index: 5, kind: input, shape index: {}]   ;;  %s1193_s6 = inlined_call_operand.vmem [shape: f32[2], index: 6, kind: input, shape index: {}]   ;;  %s1194_s7 = inlined_call_operand.hbm [shape: f32[2,4,256], index: 7, kind: output, shape index: {}]  }
   0x1   :  { %1196 = sst [smem:[#allocation12_spill]] %s1193_s6 }
   0x2   :  { %12 = vsyncpa [#allocation3], 0 }
   0x3   :  { %14 = vsyncpa [#allocation3 + $0x1], 0 }
   0x4   :  { %15 = vsyncpa [#allocation5], 0 }
   0x5   :  { %16 = vsyncpa [#allocation4], 0 }
   0x6   :  { %18 = vsyncpa [#allocation4 + $0x1], 0  ;;  %s1001_s24 = smov 0   ;;  %s1003_s25 = smov 0  }
   0x7   :  { %s1005_s26 = smov 0   ;;  %s1007_s27 = smov 0  }
   0x8   :  { %s1009_s28 = smov 0   ;;  %s1011_s29 = smov 0  }
   0x9 LB: > { %s704_s30 = sadd.s32 4294967295, %s954_s29   ;;  %s705_s8 = sadd.s32 4294967294, %s954_s29   ;;  %s954_s29 = sphi %s1011_s29, %s24_s29   ;;  %s950_s28 = sphi %s1009_s28, %s1213_s28   ;;  %s946_s27 = sphi %s1007_s27, %s1212_s27   ;;  %s942_s26 = sphi %s1005_s26, %s1211_s26   ;;  %s938_s25 = sphi %s1003_s25, %s1210_s25   ;;  %s934_s24 = sphi %s1001_s24, %s1209_s24  }
   0xa   : > { %p86_p0 = scmp.ne.s32.totalorder %s938_s25, %s934_s24  ;;  %p1035_p1 = scmp.eq.s32.totalorder %s704_s30, 0 }
   0xb   : > { %p1039_p2 = scmp.eq.s32.totalorder %s704_s30, 1  ;;  %p223_p3 = scmp.eq.s32.totalorder %s705_s8, 1 }
   0xc   : > { %p1045_p4 = por %p1035_p1, %p86_p0  ;;  %p706_p5 = scmp.ge.s32.totalorder %s954_s29, 1 }
   0xd   : > { %p1050_p6 = por %p223_p3, %p86_p0  ;;  %p230_p7 = scmp.lt.s32.totalorder %s954_s29, 3 }
   0xe   : > { %s1201_s6 = sld [smem:[#allocation12_spill]]  ;;  %s36_s17 = sadd.s32 1, %s950_s28 }
   0xf   : > { %p1058_p8 = pnand %p706_p5, %p230_p7  ;;  %s73_s18 = sadd.s32 1, %s942_s26 }
  0x10   : > { %p38_p12 = scmp.ge.s32.totalorder %s36_s17, 2  ;;  %s956_s19 = smov [#allocation6]  }
  0x11   : > { %p737_p10 = pneg %p1058_p8  ;;  %p80_p13 = scmp.ne.s32.totalorder %s942_s26, %s938_s25 }
  0x12   : > { %s1215_s17 = smov (%p38_p12, %s36_s17), 0  ;;  %p81_p0 = scmp.eq.s32.totalorder %s954_s29, 0 }
  0x13   : > { %p738_p11 = pnand %p737_p10, %p1035_p1  ;;  %1203 = sst [smem:[#allocation11_spill]] %s1215_s17 }
  0x14   : > { %s254_s15 = sshll.u32 %s1201_s6, 4  ;;  %s68_s20 = ssub.s32 %s950_s28, %s1215_s17  ;;  %s255_s15 = int_to_ptr.vmem [resolvable:$true] %s254_s15 }
  0x15   : > { %740 = dma.vmem_to_smem (!%p738_p11), %s255_s15, 16, %s956_s19, [#allocation5]  }
  0x16   : > { %p750_p3 = scmp.lt.s32.totalorder %s954_s29, 2  ;;  %p71_p5 = scmp.eq.s32.totalorder %s68_s20, 0 }
  0x17   : > { %p82_p7 = por %p81_p0, %p80_p13  ;;  %p1079_p9 = por %p1039_p2, %p80_p13 }
  0x18   : > { %s278_s22 = sand.u32 1, %s942_s26   ;;  %s726_s8 = sshll.u32 %s950_s28, 3 }
  0x19   : > { %s1085_s23 = scalar_select %p71_p5, %s942_s26, %s73_s18  }
  0x1a   : > { %s709_s30 = sshll.u32 %s278_s22, 3  ;;  %s289_s15 = scalar_lea.hbm %s1188_s1, %s726_s8 }
  0x1b   : > { %s282_s19 = scalar_lea.vmem [#allocation2], %s709_s30  ;;  %s291_s17 = sshll.u32 %s289_s15, 4  ;;  %s292_s17 = int_to_ptr.hbm [resolvable:$true] %s291_s17 }
  0x1c   : > { %s293_s6 = sshll.u32 %s282_s19, 4  ;;  %p742_p10 = pnand %p750_p3, %p82_p7  ;;  %s294_s6 = int_to_ptr.vmem [resolvable:$true] %s293_s6 }
  0x1d   : > { %s279_s10 = scalar_lea.sflag [#allocation3], %s278_s22  ;;  %302 = sbr.rel (%p1058_p8) target bundleno = 238 (0xee), region = 48 }
  0x1e   : > { %744 = dma.hbm_to_vmem [thread:$0]  (!%p742_p10), %s292_s17, 128, %s294_s6, %s279_s10  }
  0x1f   : > { %s1096_s18 = sand.u32 (!%p1058_p8), 1, %s938_s25  }
  0x20   : > { %s713_s20 = sshll.u32 (!%p1058_p8), %s1096_s18, 3  ;;  %s305_s30 = scalar_lea.sflag (!%p1058_p8), [#allocation3], %s1096_s18 }
  0x21   : > { %s1102_s8 = scalar_lea.vmem (!%p1058_p8), [#allocation2], %s713_s20 }
  0x22   : > { %921 = dma.done.wait (%p1045_p4), %s305_s30, 128  }
  0x23   : > { %923 = vsyncadd (%p1045_p4), %s305_s30, 4294967168 }
  0x24   : > { %925 = dma.done.wait (%p1035_p1), [#allocation5], 16  }
  0x25   : > { %927 = vsyncadd (%p1035_p1), [#allocation5], 4294967280 }
  0x26   : > { %319 = sfence }
  0x27   : > { %v370_v0 = vld [vmem:[%s1190_s3] sm:$0xff]  ;;  %v957_v2 = vmov 0   ;;  %v958_v3 = vmov 2   ;;  %v959_v4 = vmov 1   ;;  %v960_v6 = vmov 3   ;;  %p356_p1 = scmp.lt.s32.totalorder %s946_s27, 1 }
  0x28   : > { %v369_v1 = vld [vmem:[%s1189_s2] sm:$0xff]  ;;  %808 = vset.pattern.permute.xlu1 %v957_v2  ;;  %806 = vset.pattern.permute.xlu0 %v957_v2  ;;  %s718_s16 = sld [smem:[#allocation6 + $0x1]]  ;;  %s728_s17 = sshll.u32 %s946_s27, 3  ;;  %vm566_vm9 = vcmask 1043456  }
  0x29   : > { %429 = vperm.xlu1 %808, %v370_v0   ;;  %373 = vperm.xlu0 %806, %v369_v1   ;;  %v485_v5 = vld [vmem:[%s1191_s4] sm:$0xff]  ;;  %s357_s15 = scalar_select %p356_p1, %s946_s27, 1 }
  0x2a   : > { %810 = vset.pattern.permute.xlu2 %v958_v3  ;;  %v501_v7 = vld [vmem:[%s1192_s5] sm:$0xff]  ;;  %s585_s11 = scalar_lea.hbm %s1194_s7, %s728_s17  ;;  %s354_s27 = scalar_lea.vmem [#allocation7], %s713_s20 }
  0x2b   : > { %400 = vperm.xlu2 %810, %v369_v1   ;;  %s727_s19 = sshll.u32 %s357_s15, 3  ;;  %v1130_v10 = vld [vmem:[%s1102_s8] sm:$0xff]  ;;  %s493_s8 = sld [smem:[#allocation6]] }
  0x2c   : > { %s363_s6 = scalar_lea.vmem %s1187_s0, %s727_s19  ;;  %v445_v13 = vperm.slane %v1130_v10, 1  ;;  %v446_v14 = vperm.slane %v1130_v10, 5  ;;  %v433_v15 = vperm.slane %v1130_v10, 0  ;;  %v434_v16 = vperm.slane %v1130_v10, 4  ;;  %s587_s13 = sshll.u32 %s354_s27, 4  ;;  %s588_s13 = int_to_ptr.vmem [resolvable:$true] %s587_s13 }
  0x2d   : > { %v367_v12 = vld [vmem:[%s363_s6] sm:$0xff]  ;;  %v459_v19 = vperm.slane %v1130_v10, 2  ;;  %v460_v20 = vperm.slane %v1130_v10, 6  ;;  %v473_v32 = vperm.slane %v1130_v10, 3  ;;  %v474_v33 = vperm.slane %v1130_v10, 7  ;;  %s589_s14 = sshll.u32 %s585_s11, 4  ;;  %s590_s14 = int_to_ptr.hbm [resolvable:$true] %s589_s14 }
  0x2e   : > { %v389_v17 = vperm.slane %v367_v12, 1  ;;  %v390_v18 = vperm.slane %v367_v12, 5  ;;  %v377_v21 = vperm.slane %v367_v12, 0  ;;  %v378_v22 = vperm.slane %v367_v12, 4  ;;  %s572_s15 = scalar_lea.sflag [#allocation4], %s1096_s18  ;;  %s882_s19 = sshra.s32 %s590_s14, 4  ;;  %s883_s19 = int_to_ptr.hbm [resolvable:$true] %s882_s19 }
  0x2f   : > { %v449_v24 = vperm.slane %v445_v13, 1  ;;  %v450_v25 = vperm.slane %v446_v14, 1  ;;  %v437_v26 = vperm.slane %v433_v15, 0  ;;  %v438_v27 = vperm.slane %v434_v16, 0  ;;  %s884_s10 = scalar_lea.hbm %s883_s19, 8  ;;  %s888_s20 = scalar_lea.hbm %s1194_s7, 16 }
  0x30   : > { %v393_v28 = vperm.slane %v389_v17, 1  ;;  %v394_v29 = vperm.slane %v390_v18, 1  ;;  %v403_v30 = vperm.slane %v367_v12, 2  ;;  %v404_v31 = vperm.slane %v367_v12, 6  ;;  %p885_p2 = scmp.ne.s32.totalorder %s883_s19, %s884_s10  ;;  %p889_p11 = scmp.lt.s32.totalorder %s883_s19, %s1194_s7 }
  0x31   : > { %809 = vset.pattern.permute.xlu1 %v959_v4  ;;  %807 = vset.pattern.permute.xlu0 %v959_v4  ;;  %v463_v34 = vperm.slane %v459_v19, 2  ;;  %v464_v35 = vperm.slane %v460_v20, 2  ;;  %v381_v36 = vperm.slane %v377_v21, 0  ;;  %v382_v37 = vperm.slane %v378_v22, 0  ;;  %p890_p12 = scmp.lt.s32.totalorder %s888_s20, %s884_s10 }
  0x32   : > { %442 = vperm.xlu1 %809, %v370_v0   ;;  %386 = vperm.xlu0 %807, %v369_v1   ;;  %v417_v42 = vperm.slane %v367_v12, 3  ;;  %v418_v43 = vperm.slane %v367_v12, 7  ;;  %v407_v48 = vperm.slane %v403_v30, 2  ;;  %v408_v49 = vperm.slane %v404_v31, 2  ;;  %p886_p4 = pnand %p885_p2, %p1079_p9 }
  0x33   : > { %456 = vperm.xlu2 %810, %v370_v0   ;;  %v477_v50 = vperm.slane %v473_v32, 3  ;;  %v478_v51 = vperm.slane %v474_v33, 3  ;;  %v496_v19 = vstv %s493_s8  ;;  %p891_p13 = por %p890_p12, %p889_p11 }
  0x34   : > { %v421_v57 = vperm.slane %v417_v42, 3  ;;  %v422_v58 = vperm.slane %v418_v43, 3  ;;  %p887_p8 = pneg %p886_p4 }
  0x36   : > { %p892_p0 = pnand %p891_p13, %p887_p8 }
  0x3a   : > { %811 = vset.pattern.permute.xlu1 %v960_v6  ;;  %813 = vset.pattern.permute.xlu0 %v957_v2 }
  0x3b   : > { %414 = vperm.xlu1 %811, %v369_v1   ;;  %488 = vperm.xlu0 %813, %v485_v5  }
  0x3c   : > { %812 = vset.pattern.permute.xlu2 %v960_v6 }
  0x3d   : > { %470 = vperm.xlu2 %812, %v370_v0  }
  0x43   : > { %814 = vset.pattern.permute.xlu1 %v957_v2 }
  0x44   : > { %504 = vperm.xlu1 %814, %v501_v7  }
  0x85   : > { %v401_v8 = vpop.permute.xlu2 %400 }
  0x86   : > { %v409_v63 = vmul.f32 %v407_v48, %v401_v8  ;;  %v410_v0 = vmul.f32 %v408_v49, %v401_v8 }
  0x8d   : > { %v457_v23 = vpop.permute.xlu2 %456 }
  0x8e   : > { %v465_v59 = vmul.f32 %v463_v34, %v457_v23  ;;  %v466_v60 = vmul.f32 %v464_v35, %v457_v23 }
  0x97   : > { %v471_v56 = vpop.permute.xlu2 %470 }
  0x98   : > { %v479_v3 = vmul.f32 %v477_v50, %v471_v56  ;;  %v480_v4 = vmul.f32 %v478_v51, %v471_v56 }
  0x9b   : > { %v430_v9 = vpop.permute.xlu1 %429  ;;  %v374_v11 = vpop.permute.xlu0 %373 }
  0x9c   : > { %v439_v44 = vmul.f32 %v437_v26, %v430_v9  ;;  %v440_v45 = vmul.f32 %v438_v27, %v430_v9  ;;  %v383_v52 = vmul.f32 %v381_v36, %v374_v11  ;;  %v384_v53 = vmul.f32 %v382_v37, %v374_v11 }
  0xa4   : > { %v443_v38 = vpop.permute.xlu1 %442  ;;  %v387_v39 = vpop.permute.xlu0 %386 }
  0xa5   : > { %v451_v40 = vmul.f32 %v449_v24, %v443_v38  ;;  %v452_v41 = vmul.f32 %v450_v25, %v443_v38  ;;  %v395_v46 = vmul.f32 %v393_v28, %v387_v39  ;;  %v396_v47 = vmul.f32 %v394_v29, %v387_v39 }
  0xa6   : > { %v522_v38 = vstv %s718_s16 }
  0xa7   : > { %v453_v54 = vadd.f32 %v451_v40, %v439_v44  ;;  %v454_v55 = vadd.f32 %v452_v41, %v440_v45  ;;  %v397_v61 = vadd.f32 %v395_v46, %v383_v52  ;;  %v398_v62 = vadd.f32 %v396_v47, %v384_v53 }
  0xa9   : > { %v467_v1 = vadd.f32 %v465_v59, %v453_v54  ;;  %v468_v2 = vadd.f32 %v466_v60, %v454_v55  ;;  %v411_v6 = vadd.f32 %v409_v63, %v397_v61  ;;  %v412_v7 = vadd.f32 %v410_v0, %v398_v62 }
  0xab   : > { %v481_v12 = vadd.f32 %v479_v3, %v467_v1  ;;  %v482_v13 = vadd.f32 %v480_v4, %v468_v2 }
  0xad   : > { %v415_v5 = vpop.permute.xlu1 %414  ;;  %v489_v16 = vpop.permute.xlu0 %488 }
  0xae   : > { %v423_v9 = vmul.f32 %v421_v57, %v415_v5  ;;  %v424_v11 = vmul.f32 %v422_v58, %v415_v5 }
  0xb0   : > { %v425_v14 = vadd.f32 %v423_v9, %v411_v6  ;;  %v426_v15 = vadd.f32 %v424_v11, %v412_v7 }
  0xb2   : > { %v483_v17 = vadd.f32 %v481_v12, %v425_v14  ;;  %v484_v18 = vadd.f32 %v482_v13, %v426_v15 }
  0xb4   : > { %v491_v20 = vadd.f32 %v489_v16, %v483_v17  ;;  %v492_v8 = vadd.f32 %v489_v16, %v484_v18 }
  0xb6   : > { %v497_v21 = vmul.f32 %v496_v19, %v491_v20  ;;  %v498_v22 = vmul.f32 %v496_v19, %v492_v8  ;;  %v505_v23 = vpop.permute.xlu1 %504  ;;  %vm494_vm0 = vcmp.ge.f32.partialorder %v491_v20, 0.0  ;;  %vm495_vm1 = vcmp.ge.f32.partialorder %v492_v8, 0.0 }
  0xb8   : > { %v499_v24 = vsel %vm494_vm0, %v491_v20, %v497_v21  ;;  %v500_v25 = vsel %vm495_vm1, %v492_v8, %v498_v22 }
  0xb9   : > { %v507_v26 = vmul.f32 %v505_v23, %v499_v24  ;;  %v508_v27 = vmul.f32 %v505_v23, %v500_v25 }
  0xbb   : > { %v509_v28 = vrot.slane %v507_v26, 4  ;;  %v515_v29 = vrot.slane %v508_v27, 4 }
  0xbd   : > { %v510_v30 = vadd.f32 %v509_v28, %v507_v26  ;;  %v516_v31 = vadd.f32 %v515_v29, %v508_v27 }
  0xbf   : > { %v511_v32 = vrot.slane %v510_v30, 2  ;;  %v517_v33 = vrot.slane %v516_v31, 2 }
  0xc1   : > { %v512_v34 = vadd.f32 %v511_v32, %v510_v30  ;;  %v518_v35 = vadd.f32 %v517_v33, %v516_v31 }
  0xc3   : > { %v513_v36 = vrot.slane %v512_v34, 1  ;;  %v519_v37 = vrot.slane %v518_v35, 1 }
  0xc5   : > { %v514_v39 = vadd.f32 %v513_v36, %v512_v34  ;;  %v520_v40 = vadd.f32 %v519_v37, %v518_v35 }
  0xc7   : > { %v523_v41 = vadd.f32 %v522_v38, %v514_v39  ;;  %v524_v42 = vadd.f32 %v522_v38, %v520_v40 }
  0xc9   : > { %v719_v43 = vmul.f32 -1.442695, %v523_v41  ;;  %v720_v44 = vmul.f32 -1.442695, %v524_v42 }
  0xcb   : > { %815 = vpow2.f32 %v719_v43 }
  0xcc   : > { %817 = vpow2.f32 %v720_v44 }
  0xd1   : > { %v816_v45 = vpop.eup %815 }
  0xd2   : > { %v818_v46 = vpop.eup %817  ;;  %v531_v47 = vadd.f32 1.0, %v816_v45 }
  0xd3   : > { %v532_v48 = vadd.f32 1.0, %v818_v46 }
  0xd4   : > { %819 = vrcp.f32 %v531_v47  ;;  %vm538_vm4 = vweird.f32 %v531_v47  ;;  %v544_v60 = vand.u32 2147483648, %v531_v47  ;;  %v542_v62 = vand.u32 2147483647, %v531_v47 }
  0xd5   : > { %821 = vrcp.f32 %v532_v48  ;;  %v559_v56 = vand.u32 2147483648, %v532_v48  ;;  %v557_v58 = vand.u32 2147483647, %v532_v48  ;;  %vm553_vm6 = vweird.f32 %v532_v48 }
  0xd6   : > { %v545_v3 = vor.u32 1.1754944e-38, %v544_v60  ;;  %vm543_vm10 = vcmp.eq.f32.partialorder %v542_v62, 8.507059e+37 }
  0xd7   : > { %v560_v0 = vor.u32 1.1754944e-38, %v559_v56  ;;  %vm558_vm8 = vcmp.eq.f32.partialorder %v557_v58, 8.507059e+37 }
  0xda   : > { %v820_v49 = vpop.eup %819 }
  0xdb   : > { %v822_v50 = vpop.eup %821  ;;  %v534_v51 = vmul.f32 %v820_v49, %v531_v47  ;;  %vm539_vm2 = vweird.f32 %v820_v49 }
  0xdc   : > { %v549_v52 = vmul.f32 %v822_v50, %v532_v48  ;;  %vm554_vm3 = vweird.f32 %v822_v50  ;;  %vm1141_vm5 = vmor %vm538_vm4, %vm539_vm2 }
  0xdd   : > { %v535_v53 = vsub.f32 1.0, %v534_v51  ;;  %vm555_vm7 = vmor %vm553_vm6, %vm554_vm3 }
  0xde   : > { %v550_v54 = vsub.f32 1.0, %v549_v52 }
  0xdf   : > { %v536_v55 = vmul.f32 %v820_v49, %v535_v53 }
  0xe0   : > { %v551_v57 = vmul.f32 %v822_v50, %v550_v54 }
  0xe1   : > { %v537_v59 = vadd.f32 %v820_v49, %v536_v55 }
  0xe2   : > { %v552_v63 = vadd.f32 %v822_v50, %v551_v57 }
  0xe3   : > { %v541_v1 = vsel %vm1141_vm5, %v820_v49, %v537_v59 }
  0xe4   : > { %v556_v2 = vsel %vm555_vm7, %v822_v50, %v552_v63  ;;  %v546_v6 = vsel %vm543_vm10, %v545_v3, %v541_v1 }
  0xe5   : > { %v561_v4 = vsel %vm558_vm8, %v560_v0, %v556_v2 }
  0xe6   : > { %v565_v5 = vrot.slane %v561_v4, 4 }
  0xe8   : > { %v567_v7 = vsel %vm566_vm9, %v546_v6, %v565_v5 }
  0xe9   : > { %v569_v9 = vmul.f32 %v567_v7, %v1130_v10 }
  0xeb   : > { %570 = vst [vmem:[%s354_s27] sm:$0xff] %v569_v9 }
  0xec   : > { %895 = shalt.err (!%p892_p0)
}
  0xed   : > { %735 = dma.vmem_to_hbm [thread:$0]  (%p1079_p9), %s588_s13, 128, %s590_s14, %s572_s15  }
  0xee PF: > { %s601_s18 = sand.u32 1, %s934_s24   ;;  %p1207_p3 = scmp.ge.s32.totalorder %s954_s29, 2 }
  0xef   : > { %s602_s17 = scalar_lea.sflag [#allocation4], %s601_s18 }
  0xf0   : > { %p746_p5 = pnand %p1207_p3, %p1050_p6 }
  0xf2   : > { %p747_p7 = pneg %p746_p5 }
  0xf4   : > { %929 = dma.done.wait (%p747_p7), %s602_s17, 128  }
  0xf5   : > { %931 = vsyncadd (%p747_p7), %s602_s17, 4294967168  ;;  %s24_s29 = sadd.s32 1, %s954_s29   ;;  %s1208_s21 = sld [smem:[#allocation11_spill]] }
  0xf6   : > { %p21_p10 = scmp.ge.s32.totalorder %s24_s29, 4   ;;  %s1209_s24 = smov %s938_s25 }
  0xf7   : > { %s1210_s25 = smov %s942_s26  ;;  %s1211_s26 = smov %s1085_s23 }
  0xf8   : > { %s1212_s27 = smov %s950_s28  ;;  %23 = sbr.rel (!%p21_p10) target bundleno = 9 (0x9), region = 101 }
  0xfb   : > { %s1213_s28 = smov %s1208_s21 }
  0xfd   :  { %608 = vsyncpa [#allocation3], 1 }
  0xfe   :  { %610 = vsyncpa [#allocation3 + $0x1], 1 }
  0xff   :  { %611 = vsyncpa [#allocation4], 1 }
 0x100   :  { %613 = vsyncpa [#allocation4 + $0x1], 1 }
 0x101   :  { %614 = vsyncpa [#allocation5], 1 }
 0x102   :  { %616 = vsyncpa [#allocation5 + $0x1], 1 }

</bundles_post_ra>
